<compile_context>
chip_gen: v5e
topology: v5e:2x2
jax: 0.10.0
libtpu: 0.0.40
codegen_flags: <defaults>
</compile_context>

<pallas_src>
import functools

import jax
import jax.numpy as jnp
from jax import lax
from jax.experimental import pallas as pl
from jax.experimental.pallas import tpu as pltpu

_LANE = 128
_SUBLANE = 8


def _dice_kernel(inp_ref, tgt_ref, out_ref, inter_ref, isum_ref, tsum_ref,
                 *, valid_rows, needs_mask):
    k = pl.program_id(1)

    # Zero the per-sample accumulators on the first reduction step.
    @pl.when(k == 0)
    def _():
        inter_ref[...] = jnp.zeros_like(inter_ref)
        isum_ref[...] = jnp.zeros_like(isum_ref)
        tsum_ref[...] = jnp.zeros_like(tsum_ref)

    # (tile_rows, 128) tile in native dtype; cast to f32 for accumulation.
    x = inp_ref[0].astype(jnp.float32)
    t = tgt_ref[0].astype(jnp.float32)
    tile_rows = x.shape[0]

    if needs_mask:
        # The last reduction tile may run past the real row count; those rows
        # hold unspecified data and must be zeroed before summing.
        row = k * tile_rows + lax.broadcasted_iota(jnp.int32, x.shape, 0)
        valid = row < valid_rows
        x = jnp.where(valid, x, 0.0)
        t = jnp.where(valid, t, 0.0)

    # Fold the tile into (tile_rows // 8, 8, 128) and reduce only the leading
    # (vreg-count) axis each step: pure VPU adds into (8, 128) accumulators.
    # The expensive cross-lane reduce happens once, in the finalize branch.
    x3 = x.reshape(tile_rows // _SUBLANE, _SUBLANE, _LANE)
    t3 = t.reshape(tile_rows // _SUBLANE, _SUBLANE, _LANE)
    inter_ref[...] += jnp.sum(x3 * t3, axis=0)
    isum_ref[...] += jnp.sum(x3, axis=0)
    tsum_ref[...] += jnp.sum(t3, axis=0)

    # Finalize: per-sample dice value (lane reduce happens only here).
    @pl.when(k == pl.num_programs(1) - 1)
    def _():
        smooth = jnp.float32(1.0)
        inter = jnp.sum(inter_ref[...])
        denom = jnp.sum(isum_ref[...]) + jnp.sum(tsum_ref[...])
        dice = 2.0 * (inter + smooth) / (denom + smooth)
        out_ref[...] = jnp.full(out_ref.shape, dice, dtype=jnp.float32)


@functools.partial(jax.jit, static_argnames=("target_block_bytes",))
def dice_loss(inp, tgt, target_block_bytes=1 << 20):
    """Pallas implementation of DiceLoss.forward(input, target)."""
    N = tgt.shape[0]
    x = inp.reshape(N, -1)
    t = tgt.reshape(N, -1)
    D = x.shape[1]

    rows = pl.cdiv(D, _LANE)
    if D % _LANE != 0:
        # TODO(synk): lane-tail pad copies the inputs once; only taken when
        # C*H*W is not a multiple of 128 (the in-kernel mask covers row tails).
        pad = rows * _LANE - D
        x = jnp.pad(x, ((0, 0), (0, pad)))
        t = jnp.pad(t, ((0, 0), (0, pad)))

    # Metadata-only reshape to a sublane/lane-dense layout per sample.
    x = x.reshape(N, rows, _LANE)
    t = t.reshape(N, rows, _LANE)

    # Reduction tile: multiple of 8 sublanes, ~target_block_bytes per input
    # block in the input's native dtype (2 inputs x 2 pipeline buffers stays
    # well inside the 16/32 MiB scoped-VMEM defaults of v5e/v6e/v7x).
    itemsize = max(jnp.dtype(x.dtype).itemsize, jnp.dtype(t.dtype).itemsize)
    budget_rows = max(
        _SUBLANE,
        (target_block_bytes // (_LANE * itemsize)) // _SUBLANE * _SUBLANE)
    rows_up = pl.cdiv(rows, _SUBLANE) * _SUBLANE
    tile_rows = min(rows_up, budget_rows)
    num_k = pl.cdiv(rows, tile_rows)
    needs_mask = (rows % tile_rows) != 0

    kernel = functools.partial(
        _dice_kernel, valid_rows=rows, needs_mask=needs_mask)

    per_sample = pl.pallas_call(
        kernel,
        out_shape=jax.ShapeDtypeStruct((N, _SUBLANE, _LANE), jnp.float32),
        grid_spec=pltpu.PrefetchScalarGridSpec(
            num_scalar_prefetch=0,
            grid=(N, num_k),
            in_specs=[
                pl.BlockSpec((1, tile_rows, _LANE), lambda n, k: (n, k, 0)),
                pl.BlockSpec((1, tile_rows, _LANE), lambda n, k: (n, k, 0)),
            ],
            out_specs=pl.BlockSpec((1, _SUBLANE, _LANE),
                                   lambda n, k: (n, 0, 0)),
            scratch_shapes=[
                pltpu.VMEM((_SUBLANE, _LANE), jnp.float32),  # sum(x*t) partial
                pltpu.VMEM((_SUBLANE, _LANE), jnp.float32),  # sum(x)   partial
                pltpu.VMEM((_SUBLANE, _LANE), jnp.float32),  # sum(t)   partial
            ],
        ),
        compiler_params=pltpu.CompilerParams(
            dimension_semantics=("parallel", "arbitrary")),
    )(x, t)

    dice = per_sample[:, 0, 0]                 # N per-sample dice values
    return jnp.float32(1.0) - jnp.sum(dice) / jnp.float32(N)


def dice_loss_ref(inp, tgt):
    """Pure-JAX reference matching the PyTorch module exactly."""
    N = tgt.shape[0]
    smooth = 1.0
    x = inp.reshape(N, -1).astype(jnp.float32)
    t = tgt.reshape(N, -1).astype(jnp.float32)
    inter = jnp.sum(x * t, axis=1)
    loss = 2.0 * (inter + smooth) / (jnp.sum(x, axis=1) + jnp.sum(t, axis=1) + smooth)
    return 1.0 - jnp.sum(loss) / N


if __name__ == "__main__":
    key = jax.random.PRNGKey(0)
    k1, k2 = jax.random.split(key)

    # NCHW inputs, consistent with a segmentation prediction / mask pair.
    x = jax.random.uniform(k1, (2, 4, 16, 16), dtype=jnp.float32)
    tgt = (jax.random.uniform(k2, (2, 4, 16, 16), dtype=jnp.float32) > 0.5
           ).astype(jnp.float32)

    out = dice_loss(x, tgt)
    jax.block_until_ready(out)

    ref = dice_loss_ref(x, tgt)
    assert jnp.allclose(out, ref, atol=1e-5, rtol=1e-5), (out, ref)

    print("KERNEL_OK")
</pallas_src>

<mosaic_0001>
module attributes {stable_mosaic.version = 11 : i64} {
  func.func @_dice_kernel(%arg0: i32, %arg1: i32, %arg2: memref<1x8x128xf32, #tpu.memory_space<vmem>>, %arg3: memref<1x8x128xf32, #tpu.memory_space<vmem>>, %arg4: memref<1x8x128xf32, #tpu.memory_space<vmem>>, %arg5: memref<8x128xf32, #tpu.memory_space<vmem>>, %arg6: memref<8x128xf32, #tpu.memory_space<vmem>>, %arg7: memref<8x128xf32, #tpu.memory_space<vmem>>) attributes {dimension_semantics = [#tpu.dimension_semantics<parallel>, #tpu.dimension_semantics<arbitrary>], iteration_bounds = array<i64: 2, 1>, scalar_prefetch = 0 : i64, scratch_operands = 3 : i64, tpu.core_type = #tpu.core_type<tc>, window_params = [{transform_indices = @transform_0, window_bounds = array<i64: 1, 8, 128>}, {transform_indices = @transform_1, window_bounds = array<i64: 1, 8, 128>}, {transform_indices = @transform_2, window_bounds = array<i64: 1, 8, 128>}]} {
    %c0_i32 = arith.constant 0 : i32
    %0 = arith.cmpi eq, %arg1, %c0_i32 : i32
    %1 = arith.extui %0 : i1 to i32
    %c0_i32_0 = arith.constant 0 : i32
    %2 = arith.cmpi ne, %1, %c0_i32_0 : i32
    scf.if %2 {
      %cst_22 = arith.constant 0.000000e+00 : f32
      %25 = vector.broadcast %cst_22 : f32 to vector<8x128xf32>
      %c0_23 = arith.constant 0 : index
      %c0_24 = arith.constant 0 : index
      %26 = vector.load %arg5[%c0_23, %c0_24] : memref<8x128xf32, #tpu.memory_space<vmem>>, vector<8x128xf32>
      tpu.vector_store %arg5[%c0_23, %c0_24], %25 {strides = array<i32>} : memref<8x128xf32, #tpu.memory_space<vmem>>, vector<8x128xf32>,
      %cst_25 = arith.constant 0.000000e+00 : f32
      %27 = vector.broadcast %cst_25 : f32 to vector<8x128xf32>
      %c0_26 = arith.constant 0 : index
      %c0_27 = arith.constant 0 : index
      %28 = vector.load %arg6[%c0_26, %c0_27] : memref<8x128xf32, #tpu.memory_space<vmem>>, vector<8x128xf32>
      tpu.vector_store %arg6[%c0_26, %c0_27], %27 {strides = array<i32>} : memref<8x128xf32, #tpu.memory_space<vmem>>, vector<8x128xf32>,
      %cst_28 = arith.constant 0.000000e+00 : f32
      %29 = vector.broadcast %cst_28 : f32 to vector<8x128xf32>
      %c0_29 = arith.constant 0 : index
      %c0_30 = arith.constant 0 : index
      %30 = vector.load %arg7[%c0_29, %c0_30] : memref<8x128xf32, #tpu.memory_space<vmem>>, vector<8x128xf32>
      tpu.vector_store %arg7[%c0_29, %c0_30], %29 {strides = array<i32>} : memref<8x128xf32, #tpu.memory_space<vmem>>, vector<8x128xf32>,
    } else {
    }
    %c0 = arith.constant 0 : index
    %c0_1 = arith.constant 0 : index
    %c0_2 = arith.constant 0 : index
    %3 = vector.load %arg2[%c0, %c0_1, %c0_2] : memref<1x8x128xf32, #tpu.memory_space<vmem>>, vector<1x8x128xf32>
    %4 = vector.shape_cast %3 : vector<1x8x128xf32> to vector<8x128xf32>
    %c0_3 = arith.constant 0 : index
    %c0_4 = arith.constant 0 : index
    %c0_5 = arith.constant 0 : index
    %5 = vector.load %arg3[%c0_3, %c0_4, %c0_5] : memref<1x8x128xf32, #tpu.memory_space<vmem>>, vector<1x8x128xf32>
    %6 = vector.shape_cast %5 : vector<1x8x128xf32> to vector<8x128xf32>
    %7 = vector.shape_cast %4 : vector<8x128xf32> to vector<1x8x128xf32>
    %8 = vector.shape_cast %6 : vector<8x128xf32> to vector<1x8x128xf32>
    %c0_6 = arith.constant 0 : index
    %c0_7 = arith.constant 0 : index
    %9 = vector.load %arg5[%c0_6, %c0_7] : memref<8x128xf32, #tpu.memory_space<vmem>>, vector<8x128xf32>
    %10 = arith.mulf %7, %8 : vector<1x8x128xf32>
    %cst = arith.constant dense<0.000000e+00> : vector<8x128xf32>
    %11 = vector.multi_reduction <add>, %10, %cst [0] : vector<1x8x128xf32> to vector<8x128xf32>
    %12 = arith.addf %9, %11 : vector<8x128xf32>
    %c0_8 = arith.constant 0 : index
    %c0_9 = arith.constant 0 : index
    %13 = vector.load %arg5[%c0_8, %c0_9] : memref<8x128xf32, #tpu.memory_space<vmem>>, vector<8x128xf32>
    tpu.vector_store %arg5[%c0_8, %c0_9], %12 {strides = array<i32>} : memref<8x128xf32, #tpu.memory_space<vmem>>, vector<8x128xf32>,
    %c0_10 = arith.constant 0 : index
    %c0_11 = arith.constant 0 : index
    %14 = vector.load %arg6[%c0_10, %c0_11] : memref<8x128xf32, #tpu.memory_space<vmem>>, vector<8x128xf32>
    %cst_12 = arith.constant dense<0.000000e+00> : vector<8x128xf32>
    %15 = vector.multi_reduction <add>, %7, %cst_12 [0] : vector<1x8x128xf32> to vector<8x128xf32>
    %16 = arith.addf %14, %15 : vector<8x128xf32>
    %c0_13 = arith.constant 0 : index
    %c0_14 = arith.constant 0 : index
    %17 = vector.load %arg6[%c0_13, %c0_14] : memref<8x128xf32, #tpu.memory_space<vmem>>, vector<8x128xf32>
    tpu.vector_store %arg6[%c0_13, %c0_14], %16 {strides = array<i32>} : memref<8x128xf32, #tpu.memory_space<vmem>>, vector<8x128xf32>,
    %c0_15 = arith.constant 0 : index
    %c0_16 = arith.constant 0 : index
    %18 = vector.load %arg7[%c0_15, %c0_16] : memref<8x128xf32, #tpu.memory_space<vmem>>, vector<8x128xf32>
    %cst_17 = arith.constant dense<0.000000e+00> : vector<8x128xf32>
    %19 = vector.multi_reduction <add>, %8, %cst_17 [0] : vector<1x8x128xf32> to vector<8x128xf32>
    %20 = arith.addf %18, %19 : vector<8x128xf32>
    %c0_18 = arith.constant 0 : index
    %c0_19 = arith.constant 0 : index
    %21 = vector.load %arg7[%c0_18, %c0_19] : memref<8x128xf32, #tpu.memory_space<vmem>>, vector<8x128xf32>
    tpu.vector_store %arg7[%c0_18, %c0_19], %20 {strides = array<i32>} : memref<8x128xf32, #tpu.memory_space<vmem>>, vector<8x128xf32>,
    %c0_i32_20 = arith.constant 0 : i32
    %22 = arith.cmpi eq, %arg1, %c0_i32_20 : i32
    %23 = arith.extui %22 : i1 to i32
    %c0_i32_21 = arith.constant 0 : i32
    %24 = arith.cmpi ne, %23, %c0_i32_21 : i32
    scf.if %24 {
      %c0_22 = arith.constant 0 : index
      %c0_23 = arith.constant 0 : index
      %25 = vector.load %arg5[%c0_22, %c0_23] : memref<8x128xf32, #tpu.memory_space<vmem>>, vector<8x128xf32>
      %26 = vector.shape_cast %25 : vector<8x128xf32> to vector<1x8x128xf32>
      %cst_24 = arith.constant dense<0.000000e+00> : vector<1xf32>
      %27 = vector.multi_reduction <add>, %26, %cst_24 [1, 2] : vector<1x8x128xf32> to vector<1xf32>
      %28 = vector.shape_cast %27 : vector<1xf32> to vector<1x1x1xf32>
      %29 = vector.extract %28[0, 0, 0] : f32 from vector<1x1x1xf32>
      %c0_25 = arith.constant 0 : index
      %c0_26 = arith.constant 0 : index
      %30 = vector.load %arg6[%c0_25, %c0_26] : memref<8x128xf32, #tpu.memory_space<vmem>>, vector<8x128xf32>
      %31 = vector.shape_cast %30 : vector<8x128xf32> to vector<1x8x128xf32>
      %cst_27 = arith.constant dense<0.000000e+00> : vector<1xf32>
      %32 = vector.multi_reduction <add>, %31, %cst_27 [1, 2] : vector<1x8x128xf32> to vector<1xf32>
      %33 = vector.shape_cast %32 : vector<1xf32> to vector<1x1x1xf32>
      %34 = vector.extract %33[0, 0, 0] : f32 from vector<1x1x1xf32>
      %c0_28 = arith.constant 0 : index
      %c0_29 = arith.constant 0 : index
      %35 = vector.load %arg7[%c0_28, %c0_29] : memref<8x128xf32, #tpu.memory_space<vmem>>, vector<8x128xf32>
      %36 = vector.shape_cast %35 : vector<8x128xf32> to vector<1x8x128xf32>
      %cst_30 = arith.constant dense<0.000000e+00> : vector<1xf32>
      %37 = vector.multi_reduction <add>, %36, %cst_30 [1, 2] : vector<1x8x128xf32> to vector<1xf32>
      %38 = vector.shape_cast %37 : vector<1xf32> to vector<1x1x1xf32>
      %39 = vector.extract %38[0, 0, 0] : f32 from vector<1x1x1xf32>
      %40 = arith.addf %34, %39 : f32
      %cst_31 = arith.constant 1.000000e+00 : f32
      %41 = arith.addf %29, %cst_31 : f32
      %cst_32 = arith.constant 2.000000e+00 : f32
      %42 = arith.mulf %cst_32, %41 : f32
      %cst_33 = arith.constant 1.000000e+00 : f32
      %43 = arith.addf %40, %cst_33 : f32
      %44 = arith.divf %42, %43 : f32
      %45 = vector.broadcast %44 : f32 to vector<1x8x128xf32>
      %c0_34 = arith.constant 0 : index
      %c0_35 = arith.constant 0 : index
      %c0_36 = arith.constant 0 : index
      %46 = vector.load %arg4[%c0_34, %c0_35, %c0_36] : memref<1x8x128xf32, #tpu.memory_space<vmem>>, vector<1x8x128xf32>
      tpu.vector_store %arg4[%c0_34, %c0_35, %c0_36], %45 {strides = array<i32>} : memref<1x8x128xf32, #tpu.memory_space<vmem>>, vector<1x8x128xf32>,
    } else {
    }
    return
  }
  func.func @transform_0(%arg0: i32, %arg1: i32) -> (i32, i32, i32) {
    %c0_i32 = arith.constant 0 : i32
    %c0_i32_0 = arith.constant 0 : i32
    return %arg0, %arg1, %c0_i32 : i32, i32, i32
  }
  func.func @transform_1(%arg0: i32, %arg1: i32) -> (i32, i32, i32) {
    %c0_i32 = arith.constant 0 : i32
    %c0_i32_0 = arith.constant 0 : i32
    return %arg0, %arg1, %c0_i32 : i32, i32, i32
  }
  func.func @transform_2(%arg0: i32, %arg1: i32) -> (i32, i32, i32) {
    %c0_i32 = arith.constant 0 : i32
    %c0_i32_0 = arith.constant 0 : i32
    %c0_i32_1 = arith.constant 0 : i32
    return %arg0, %c0_i32, %c0_i32_0 : i32, i32, i32
  }
}

</mosaic_0001>

<bundles_post_ra>
// kernel: dice_loss.1
= control target key start
LH: loop header
LB: loop body
LE: loop exit
PB: predicated region body
PF: predicated region fallthrough
CT: control target
= control target key end

     0   :  { %s430_s9 = smov 0   ;;  %s432_s10 = smov 0   ;;  %s471_s0 = inlined_call_operand.vmem [shape: f32[2,8,128], index: 0, kind: input, shape index: {}]   ;;  %s472_s1 = inlined_call_operand.vmem [shape: f32[2,8,128], index: 1, kind: input, shape index: {}]   ;;  %s473_s2 = inlined_call_operand.vmem [shape: f32[2,8,128], index: 2, kind: output, shape index: {}]  }
   0x1   :  { %s434_s11 = smov 0  }
   0x2 LB: > { %s24_s12 = sadd.s32 1, %s409_s10  ;;  %p351_p0 = scmp.ge.s32.totalorder %s413_s11, 1  ;;  %s413_s11 = sphi %s434_s11, %s12_s11   ;;  %s409_s10 = sphi %s432_s10, %s475_s10   ;;  %s405_s9 = sphi %s430_s9, %s474_s9  }
   0x3   : > { %p26_p1 = scmp.ge.s32.totalorder %s24_s12, 2  ;;  %p142_p2 = scmp.lt.s32.totalorder %s413_s11, 3 }
   0x5   : > { %s477_s12 = smov (%p26_p1, %s24_s12), 0  ;;  %p143_p3 = pnand %p351_p0, %p142_p2 }
   0x6   : > { %p172_p4 = scmp.lt.s32.totalorder (!%p143_p3), %s405_s9, 1 }
   0x7   : > { %146 = sbr.rel (%p143_p3) target bundleno = 282 (0x11a), region = 28 }
   0xc   : > { %s479_s9 = smov (!%p172_p4, %s405_s9), 1 }
   0xd   : > { %s448_s13 = sshll.u32 %s479_s9, 3 }
   0xe   : > { %s178_s16 = scalar_lea.vmem %s471_s0, %s448_s13  ;;  %s185_s19 = scalar_lea.vmem %s472_s1, %s448_s13 }
   0xf   : > { %v197_v0 = vld [vmem:[%s178_s16] sm:$0xff]  ;;  %s189_s30 = scalar_lea.vmem %s473_s2, %s448_s13 }
  0x10   : > { %v198_v1 = vld [vmem:[%s185_s19] sm:$0xff] }
  0x11   : > { %v200_v2 = vmul.f32 %v198_v1, %v197_v0  ;;  %236 = vadd.xlane.f32.xlu1 %v198_v1 }
  0x13   : > { %216 = vadd.xlane.f32.xlu0 %v200_v2 }
  0x1b   : > { %226 = vadd.xlane.f32.xlu0 %v197_v0 }
  0x84   : > { %v237_v3 = vpop.xlane.xlu1 %236 }
  0x85   : > { %v238_v5 = vrot.slane %v237_v3, 4 }
  0x86   : > { %v217_v4 = vpop.xlane.xlu0 %216 }
  0x87   : > { %v218_v6 = vrot.slane %v217_v4, 4  ;;  %v239_v8 = vadd.f32 %v238_v5, %v237_v3 }
  0x89   : > { %v219_v7 = vadd.f32 %v218_v6, %v217_v4  ;;  %v240_v11 = vrot.slane %v239_v8, 2 }
  0x8b   : > { %v220_v9 = vrot.slane %v219_v7, 2  ;;  %v241_v17 = vadd.f32 %v240_v11, %v239_v8 }
  0x8d   : > { %v221_v10 = vadd.f32 %v220_v9, %v219_v7  ;;  %v242_v20 = vrot.slane %v241_v17, 1 }
  0x8e   : > { %v227_v12 = vpop.xlane.xlu0 %226 }
  0x8f   : > { %v228_v13 = vrot.slane %v227_v12, 4  ;;  %v222_v14 = vrot.slane %v221_v10, 1  ;;  %v243_v23 = vadd.f32 %v242_v20, %v241_v17 }
  0x91   : > { %v229_v15 = vadd.f32 %v228_v13, %v227_v12  ;;  %v223_v16 = vadd.f32 %v222_v14, %v221_v10 }
  0x93   : > { %v230_v18 = vrot.slane %v229_v15, 2  ;;  %357 = vpush %v223_v16 }
  0x95   : > { %v231_v19 = vadd.f32 %v230_v18, %v229_v15 }
  0x97   : > { %v232_v21 = vrot.slane %v231_v19, 1 }
  0x99   : > { %v233_v22 = vadd.f32 %v232_v21, %v231_v19 }
  0x9b   : > { %359 = vpush %v233_v22 }
  0x9c   : > { %361 = vpush %v243_v23 }
  0xc4   : > { %s358_s20 = spop %357 }
  0xc5   : > { %s246_s25 = sadd.f32 1.0, %s358_s20 }
  0xc7   : > { %s247_s26 = smul.f32 2.0, %s246_s25 }
  0xcc   : > { %s360_s21 = spop %359 }
  0xcd   : > { %s362_s22 = spop %361 }
  0xce   : > { %s245_s23 = sadd.f32 %s362_s22, %s360_s21 }
  0xd0   : > { %s248_s24 = sadd.f32 1.0, %s245_s23 }
  0xd2   : > { %v249_v24 = vstv %s248_s24 }
  0xd3   : > { %389 = vrcp.f32 %v249_v24  ;;  %v261_v28 = vand.u32 2147483648, %v249_v24  ;;  %v259_v30 = vand.u32 2147483647, %v249_v24  ;;  %vm255_vm1 = vweird.f32 %v249_v24 }
  0xd5   : > { %v262_v32 = vor.u32 1.1754944e-38, %v261_v28  ;;  %vm260_vm3 = vcmp.eq.f32.partialorder %v259_v30, 8.507059e+37 }
  0xd9   : > { %v390_v25 = vpop.eup %389 }
  0xda   : > { %v251_v26 = vmul.f32 %v390_v25, %v249_v24  ;;  %vm256_vm0 = vweird.f32 %v390_v25 }
  0xdb   : > { %vm257_vm2 = vmor %vm255_vm1, %vm256_vm0 }
  0xdc   : > { %v252_v27 = vsub.f32 1.0, %v251_v26 }
  0xde   : > { %v253_v29 = vmul.f32 %v390_v25, %v252_v27 }
  0xe0   : > { %v254_v31 = vadd.f32 %v390_v25, %v253_v29 }
  0xe2   : > { %v258_v33 = vsel %vm257_vm2, %v390_v25, %v254_v31 }
  0xe3   : > { %v263_v34 = vsel %vm260_vm3, %v262_v32, %v258_v33 }
  0xe4   : > { %363 = vpush %v263_v34 }
 0x115   : > { %s364_s27 = spop %363 }
 0x116   : > { %s265_s3 = smul.f32 %s364_s27, %s247_s26 }
 0x118   : > { %v266_v35 = vstv %s265_s3 }
 0x119   : > { %267 = vst [vmem:[%s189_s30] sm:$0xff] %v266_v35 }
 0x11a PF: > { %s12_s11 = sadd.s32 1, %s413_s11   ;;  %s474_s9 = smov %s409_s10 }
 0x11b   : > { %p9_p5 = scmp.ge.s32.totalorder %s12_s11, 4   ;;  %s475_s10 = smov %s477_s12 }
 0x11d   :  { %11 = sbr.rel (!%p9_p5) target bundleno = 2 (0x2), region = 69 }

</bundles_post_ra>
